<compile_context>
chip_gen: v6e
topology: v6e:2x2x1
jax: 0.10.0
libtpu: 0.0.40
codegen_flags: <defaults>
</compile_context>

<pallas_src>
import functools

import numpy as np
import jax
import jax.numpy as jnp
from jax.experimental import pallas as pl
from jax.experimental.pallas import tpu as pltpu

_LANES = 128      # lane axis: task index (padded to a full vreg row)
_SUBLANES = 8     # sublane axis: which quantity

# Packed-state row layout (input and output share this layout; the tile is
# aliased in place, so it round-trips between steps unchanged):
#   row 0: running_mean_L
#   row 1: running_mean_l
#   row 2: running_S_l
#   row 3: running_std_l
#   row 4: iteration counter (f32, broadcast across lanes; starts at -1)
#   row 5: alphas          (output of the current step; never read as input)
#   row 6: weighted loss   (output of the current step; never read as input)
#   row 7: unused (never read, never written)
_ROW_RML = 0
_ROW_RMl = 1
_ROW_RSL = 2
_ROW_RSTD = 3
_ROW_IT = 4
_ROW_ALPHAS = 5
_ROW_LOSS = 6


def _covweight_kernel(v_num, L_ref, state_ref, out_ref):
    # L_ref    : VMEM (1, 128)  f32 -- current unweighted losses (lanes >= v_num are 0)
    # state_ref: VMEM (8, 128)  f32 -- packed running statistics + counter
    # out_ref  : VMEM (8, 128)  f32 -- aliased to state_ref's buffer (in-place update)
    tile = state_ref[...]                                  # one vreg-sized load
    L = L_ref[...]                                         # (1, 128)

    rmL = tile[_ROW_RML:_ROW_RML + 1, :]
    rml = tile[_ROW_RMl:_ROW_RMl + 1, :]
    rSl = tile[_ROW_RSL:_ROW_RSL + 1, :]
    rstdl = tile[_ROW_RSTD:_ROW_RSTD + 1, :]
    itv = tile[_ROW_IT:_ROW_IT + 1, :] + 1.0               # incremented counter (vector)

    lane = jax.lax.broadcasted_iota(jnp.int32, (1, _LANES), 1)
    valid = lane < v_num                                   # mask out padded lanes

    it_is0 = itv == 0.0
    first_two = itv <= 1.0

    # l = L / L0, with L0 = L on the very first step, else running mean of L.
    L0 = jnp.where(it_is0, L, rmL)
    L0 = jnp.where(valid, L0, 1.0)                         # padded lanes: keep NaN-free
    l = L / L0

    # CoV weights (uniform for the first two steps).  Denominators are zero on
    # those steps; guard them - the result is masked out by `it <= 1` anyway,
    # this just keeps the kernel NaN/Inf free (documented divergence above).
    rml_safe = jnp.where(rml == 0.0, 1.0, rml)
    ls = jnp.where(valid, rstdl / rml_safe, 0.0)
    ls_sum = jnp.sum(ls, keepdims=True)                    # (1, 1)
    ls_sum = jnp.where(ls_sum == 0.0, 1.0, ls_sum)
    inv_sum = pl.reciprocal(ls_sum, approx=True)           # single EUP op
    alphas_cov = ls * inv_sum
    alphas_uni = jnp.where(valid, jnp.float32(1.0 / v_num), 0.0)
    alphas = jnp.where(first_two, alphas_uni, alphas_cov)

    mean_param = jnp.where(it_is0, 0.0, 1.0 - 1.0 / (itv + 1.0))

    # Welford-style running stats of l.  Note: (l - rmL) intentionally uses the
    # *previous* running mean of L, faithfully reproducing the PyTorch module.
    new_rml = mean_param * rml + (1.0 - mean_param) * l
    new_rSl = rSl + (l - rmL) * (l - new_rml)
    new_rstd = jnp.sqrt(new_rSl / (itv + 1.0) + 1e-8)
    new_rmL = mean_param * rmL + (1.0 - mean_param) * L

    # Weighted loss = sum_i alphas[i] * L[i]  (VPU mul + XLU lane reduction).
    loss = jnp.sum(jnp.where(valid, alphas * L, 0.0))

    out_ref[_ROW_RML:_ROW_RML + 1, :] = new_rmL
    out_ref[_ROW_RMl:_ROW_RMl + 1, :] = new_rml
    out_ref[_ROW_RSL:_ROW_RSL + 1, :] = new_rSl
    out_ref[_ROW_RSTD:_ROW_RSTD + 1, :] = new_rstd
    out_ref[_ROW_IT:_ROW_IT + 1, :] = itv
    out_ref[_ROW_ALPHAS:_ROW_ALPHAS + 1, :] = alphas
    out_ref[_ROW_LOSS:_ROW_LOSS + 1, :] = jnp.broadcast_to(loss, (1, _LANES))
    # row 7 intentionally left untouched: never read, no zero-fill needed.


def covweight_init_state():
    """Fresh packed state: all stats zero, iteration counter at -1."""
    return jnp.zeros((_SUBLANES, _LANES), jnp.float32).at[_ROW_IT].set(-1.0)


def make_covweight_step(v_num):
    """Pure functional step: (state, *losses) -> (new_state, loss, alphas).

    This is jit-free and side-effect-free so it can (and should) be fused
    directly into the caller's training-step jit.
    """
    assert 0 < v_num <= _LANES

    call = pl.pallas_call(
        functools.partial(_covweight_kernel, v_num),
        out_shape=jax.ShapeDtypeStruct((_SUBLANES, _LANES), jnp.float32),
        in_specs=[pl.BlockSpec(memory_space=pltpu.VMEM),    # current losses row
                  pl.BlockSpec(memory_space=pltpu.VMEM)],   # packed state
        out_specs=pl.BlockSpec(memory_space=pltpu.VMEM),    # packed state (updated)
        input_output_aliases={1: 0},                        # update state in place
        cost_estimate=pl.CostEstimate(flops=3_000, transcendentals=128,
                                      bytes_accessed=8_192),
    )

    def step(state, *losses):
        L = jnp.stack([jnp.asarray(x).astype(jnp.float32).reshape(()) for x in losses])
        L_row = jnp.zeros((1, _LANES), jnp.float32).at[0, :v_num].set(L)
        new_state = call(L_row, state)
        loss = new_state[_ROW_LOSS, 0]
        alphas = new_state[_ROW_ALPHAS, :v_num]
        return new_state, loss, alphas

    return step


class CovWeightLoss:
    """Stateful wrapper mirroring the PyTorch module; math runs in the Pallas kernel.

    For best performance in a real training loop, use `self.functional_step`
    (or `make_covweight_step`) inside your training-step jit instead of this
    per-call stateful interface.
    """

    def __init__(self, v_num, key=None):
        self.v_num = v_num
        if key is None:
            key = jax.random.PRNGKey(0)
        # nn.Parameter sigma: shape (v_num,); unused in forward (matches reference).
        # TODO(synk): sigma has no gradient path here (it is unused in the reference forward).
        self.sigma = jax.random.normal(key, (v_num,), jnp.float32)
        self.alphas = jnp.zeros((v_num,), jnp.float32)
        self.functional_step = make_covweight_step(v_num)   # pure; fuse into caller's jit
        self._jit_step = jax.jit(self.functional_step, donate_argnums=(0,))
        self._state = covweight_init_state()

    @property
    def current_iter(self):
        # Host read; for inspection only (forces a sync).
        return int(self._state[_ROW_IT, 0])

    def __call__(self, *losses):
        assert len(losses) == self.v_num
        self._state, loss, self.alphas = self._jit_step(self._state, *losses)
        return loss  # device scalar; no host sync here


def _reference(losses_seq, v_num):
    """Pure-numpy transcription of the PyTorch forward, for verification."""
    rmL = np.zeros(v_num, np.float64)
    rml = np.zeros(v_num, np.float64)
    rSl = np.zeros(v_num, np.float64)
    rstdl = None
    out = []
    for it, L in enumerate(losses_seq):
        L = np.asarray(L, np.float64)
        L0 = L.copy() if it == 0 else rmL
        l = L / L0
        if it <= 1:
            alphas = np.ones(v_num) / v_num
        else:
            ls = rstdl / rml
            alphas = ls / ls.sum()
        mean_param = 0.0 if it == 0 else 1.0 - 1.0 / (it + 1)
        new_mean_l = mean_param * rml + (1 - mean_param) * l
        rSl = rSl + (l - rmL) * (l - new_mean_l)
        rml = new_mean_l
        rstdl = np.sqrt(rSl / (it + 1) + 1e-8)
        rmL = mean_param * rmL + (1 - mean_param) * L
        out.append(float((alphas * L).sum()))
    return out


if __name__ == "__main__":
    v_num = 2
    key = jax.random.PRNGKey(0)
    k_sigma, k_losses = jax.random.split(key)

    # Three iterations of (loss0, loss1) pairs; strictly positive, deterministic.
    raw = jax.random.uniform(k_losses, (3, v_num), jnp.float32, minval=0.1, maxval=2.0)
    raw_np = np.asarray(raw)

    module = CovWeightLoss(v_num, key=k_sigma)

    got = []
    for i in range(raw_np.shape[0]):
        got.append(module(raw[i, 0], raw[i, 1]))   # no per-step host sync
    got = jax.block_until_ready(jnp.stack(got))    # single sync at the end

    want = _reference([raw_np[i] for i in range(raw_np.shape[0])], v_num)
    # rtol relaxed to 1e-3: alphas normalization uses the approximate EUP
    # reciprocal (rel. err ~2e-4); everything feeding the running stats stays
    # full precision.
    np.testing.assert_allclose(np.asarray(got), np.asarray(want),
                               rtol=1e-3, atol=1e-5)

    print("KERNEL_OK")
</pallas_src>

<mosaic_0001>
module attributes {stable_mosaic.version = 11 : i64} {
  func.func @_covweight_kernel(%arg0: memref<1x128xf32, #tpu.memory_space<vmem>>, %arg1: memref<8x128xf32, #tpu.memory_space<vmem>>, %arg2: memref<8x128xf32, #tpu.memory_space<vmem>>) attributes {dimension_semantics = [], scalar_prefetch = 0 : i64, scratch_operands = 0 : i64, tpu.core_type = #tpu.core_type<tc>} {
    %c0 = arith.constant 0 : index
    %c0_0 = arith.constant 0 : index
    %0 = vector.load %arg1[%c0, %c0_0] : memref<8x128xf32, #tpu.memory_space<vmem>>, vector<8x128xf32>
    %c0_1 = arith.constant 0 : index
    %c0_2 = arith.constant 0 : index
    %1 = vector.load %arg0[%c0_1, %c0_2] : memref<1x128xf32, #tpu.memory_space<vmem>>, vector<1x128xf32>
    %2 = vector.extract_strided_slice %0 {offsets = [0, 0], sizes = [1, 128], strides = [1, 1]} : vector<8x128xf32> to vector<1x128xf32>
    %3 = vector.extract_strided_slice %0 {offsets = [1, 0], sizes = [1, 128], strides = [1, 1]} : vector<8x128xf32> to vector<1x128xf32>
    %4 = vector.extract_strided_slice %0 {offsets = [2, 0], sizes = [1, 128], strides = [1, 1]} : vector<8x128xf32> to vector<1x128xf32>
    %5 = vector.extract_strided_slice %0 {offsets = [3, 0], sizes = [1, 128], strides = [1, 1]} : vector<8x128xf32> to vector<1x128xf32>
    %6 = vector.extract_strided_slice %0 {offsets = [4, 0], sizes = [1, 128], strides = [1, 1]} : vector<8x128xf32> to vector<1x128xf32>
    %cst = arith.constant 1.000000e+00 : f32
    %7 = vector.broadcast %cst : f32 to vector<1x128xf32>
    %8 = arith.addf %6, %7 : vector<1x128xf32>
    %9 = tpu.iota {dimensions = array<i32: 1>} : vector<1x128xi32>
    %c2_i32 = arith.constant 2 : i32
    %10 = vector.broadcast %c2_i32 : i32 to vector<1x128xi32>
    %11 = arith.cmpi slt, %9, %10 : vector<1x128xi32>
    %cst_3 = arith.constant 0.000000e+00 : f32
    %12 = vector.broadcast %cst_3 : f32 to vector<1x128xf32>
    %13 = arith.cmpf oeq, %8, %12 : vector<1x128xf32>
    %cst_4 = arith.constant 1.000000e+00 : f32
    %14 = vector.broadcast %cst_4 : f32 to vector<1x128xf32>
    %15 = arith.cmpf ole, %8, %14 : vector<1x128xf32>
    %16 = arith.select %13, %1, %2 : vector<1x128xi1>, vector<1x128xf32>
    %cst_5 = arith.constant 1.000000e+00 : f32
    %17 = vector.broadcast %cst_5 : f32 to vector<1x128xf32>
    %18 = arith.select %11, %16, %17 : vector<1x128xi1>, vector<1x128xf32>
    %19 = arith.divf %1, %18 : vector<1x128xf32>
    %cst_6 = arith.constant 0.000000e+00 : f32
    %20 = vector.broadcast %cst_6 : f32 to vector<1x128xf32>
    %21 = arith.cmpf oeq, %3, %20 : vector<1x128xf32>
    %cst_7 = arith.constant 1.000000e+00 : f32
    %22 = vector.broadcast %cst_7 : f32 to vector<1x128xf32>
    %23 = arith.select %21, %22, %3 : vector<1x128xi1>, vector<1x128xf32>
    %24 = arith.divf %5, %23 : vector<1x128xf32>
    %cst_8 = arith.constant 0.000000e+00 : f32
    %25 = vector.broadcast %cst_8 : f32 to vector<1x128xf32>
    %26 = arith.select %11, %24, %25 : vector<1x128xi1>, vector<1x128xf32>
    %27 = vector.shape_cast %26 : vector<1x128xf32> to vector<1x1x128xf32>
    %cst_9 = arith.constant dense<0.000000e+00> : vector<1xf32>
    %28 = vector.multi_reduction <add>, %27, %cst_9 [1, 2] : vector<1x1x128xf32> to vector<1xf32>
    %29 = vector.shape_cast %28 : vector<1xf32> to vector<1x1x1xf32>
    %30 = vector.extract %29[0, 0, 0] : f32 from vector<1x1x1xf32>
    %31 = vector.broadcast %30 : f32 to vector<1x1xf32>
    %cst_10 = arith.constant 0.000000e+00 : f32
    %32 = vector.broadcast %cst_10 : f32 to vector<1x1xf32>
    %33 = arith.cmpf oeq, %31, %32 : vector<1x1xf32>
    %cst_11 = arith.constant 1.000000e+00 : f32
    %34 = vector.broadcast %cst_11 : f32 to vector<1x1xf32>
    %35 = arith.select %33, %34, %31 : vector<1x1xi1>, vector<1x1xf32>
    %36 = tpu.reciprocal %35 {approx = true} : vector<1x1xf32> -> vector<1x1xf32>
    %37 = vector.broadcast %36 : vector<1x1xf32> to vector<1x128xf32>
    %38 = arith.mulf %26, %37 : vector<1x128xf32>
    %cst_12 = arith.constant 5.000000e-01 : f32
    %cst_13 = arith.constant 0.000000e+00 : f32
    %39 = vector.broadcast %cst_12 : f32 to vector<1x128xf32>
    %40 = vector.broadcast %cst_13 : f32 to vector<1x128xf32>
    %41 = arith.select %11, %39, %40 : vector<1x128xi1>, vector<1x128xf32>
    %42 = arith.select %15, %41, %38 : vector<1x128xi1>, vector<1x128xf32>
    %cst_14 = arith.constant 1.000000e+00 : f32
    %43 = vector.broadcast %cst_14 : f32 to vector<1x128xf32>
    %44 = arith.addf %8, %43 : vector<1x128xf32>
    %cst_15 = arith.constant 1.000000e+00 : f32
    %45 = vector.broadcast %cst_15 : f32 to vector<1x128xf32>
    %46 = arith.divf %45, %44 : vector<1x128xf32>
    %cst_16 = arith.constant 1.000000e+00 : f32
    %47 = vector.broadcast %cst_16 : f32 to vector<1x128xf32>
    %48 = arith.subf %47, %46 : vector<1x128xf32>
    %cst_17 = arith.constant 0.000000e+00 : f32
    %49 = vector.broadcast %cst_17 : f32 to vector<1x128xf32>
    %50 = arith.select %13, %49, %48 : vector<1x128xi1>, vector<1x128xf32>
    %51 = arith.mulf %50, %3 : vector<1x128xf32>
    %cst_18 = arith.constant 1.000000e+00 : f32
    %52 = vector.broadcast %cst_18 : f32 to vector<1x128xf32>
    %53 = arith.subf %52, %50 : vector<1x128xf32>
    %54 = arith.mulf %53, %19 : vector<1x128xf32>
    %55 = arith.addf %51, %54 : vector<1x128xf32>
    %56 = arith.subf %19, %2 : vector<1x128xf32>
    %57 = arith.subf %19, %55 : vector<1x128xf32>
    %58 = arith.mulf %56, %57 : vector<1x128xf32>
    %59 = arith.addf %4, %58 : vector<1x128xf32>
    %cst_19 = arith.constant 1.000000e+00 : f32
    %60 = vector.broadcast %cst_19 : f32 to vector<1x128xf32>
    %61 = arith.addf %8, %60 : vector<1x128xf32>
    %62 = arith.divf %59, %61 : vector<1x128xf32>
    %cst_20 = arith.constant 9.99999993E-9 : f32
    %63 = vector.broadcast %cst_20 : f32 to vector<1x128xf32>
    %64 = arith.addf %62, %63 : vector<1x128xf32>
    %65 = math.sqrt %64 : vector<1x128xf32>
    %66 = arith.mulf %50, %2 : vector<1x128xf32>
    %cst_21 = arith.constant 1.000000e+00 : f32
    %67 = vector.broadcast %cst_21 : f32 to vector<1x128xf32>
    %68 = arith.subf %67, %50 : vector<1x128xf32>
    %69 = arith.mulf %68, %1 : vector<1x128xf32>
    %70 = arith.addf %66, %69 : vector<1x128xf32>
    %71 = arith.mulf %42, %1 : vector<1x128xf32>
    %cst_22 = arith.constant 0.000000e+00 : f32
    %72 = vector.broadcast %cst_22 : f32 to vector<1x128xf32>
    %73 = arith.select %11, %71, %72 : vector<1x128xi1>, vector<1x128xf32>
    %74 = vector.shape_cast %73 : vector<1x128xf32> to vector<1x1x128xf32>
    %cst_23 = arith.constant dense<0.000000e+00> : vector<1xf32>
    %75 = vector.multi_reduction <add>, %74, %cst_23 [1, 2] : vector<1x1x128xf32> to vector<1xf32>
    %76 = vector.shape_cast %75 : vector<1xf32> to vector<1x1x1xf32>
    %77 = vector.extract %76[0, 0, 0] : f32 from vector<1x1x1xf32>
    %c0_24 = arith.constant 0 : index
    %c0_25 = arith.constant 0 : index
    %78 = vector.load %arg2[%c0_24, %c0_25] : memref<8x128xf32, #tpu.memory_space<vmem>>, vector<1x128xf32>
    tpu.vector_store %arg2[%c0_24, %c0_25], %70 {strides = array<i32>} : memref<8x128xf32, #tpu.memory_space<vmem>>, vector<1x128xf32>,
    %c1 = arith.constant 1 : index
    %c0_26 = arith.constant 0 : index
    %79 = vector.load %arg2[%c1, %c0_26] : memref<8x128xf32, #tpu.memory_space<vmem>>, vector<1x128xf32>
    tpu.vector_store %arg2[%c1, %c0_26], %55 {strides = array<i32>} : memref<8x128xf32, #tpu.memory_space<vmem>>, vector<1x128xf32>,
    %c2 = arith.constant 2 : index
    %c0_27 = arith.constant 0 : index
    %80 = vector.load %arg2[%c2, %c0_27] : memref<8x128xf32, #tpu.memory_space<vmem>>, vector<1x128xf32>
    tpu.vector_store %arg2[%c2, %c0_27], %59 {strides = array<i32>} : memref<8x128xf32, #tpu.memory_space<vmem>>, vector<1x128xf32>,
    %c3 = arith.constant 3 : index
    %c0_28 = arith.constant 0 : index
    %81 = vector.load %arg2[%c3, %c0_28] : memref<8x128xf32, #tpu.memory_space<vmem>>, vector<1x128xf32>
    tpu.vector_store %arg2[%c3, %c0_28], %65 {strides = array<i32>} : memref<8x128xf32, #tpu.memory_space<vmem>>, vector<1x128xf32>,
    %c4 = arith.constant 4 : index
    %c0_29 = arith.constant 0 : index
    %82 = vector.load %arg2[%c4, %c0_29] : memref<8x128xf32, #tpu.memory_space<vmem>>, vector<1x128xf32>
    tpu.vector_store %arg2[%c4, %c0_29], %8 {strides = array<i32>} : memref<8x128xf32, #tpu.memory_space<vmem>>, vector<1x128xf32>,
    %c5 = arith.constant 5 : index
    %c0_30 = arith.constant 0 : index
    %83 = vector.load %arg2[%c5, %c0_30] : memref<8x128xf32, #tpu.memory_space<vmem>>, vector<1x128xf32>
    tpu.vector_store %arg2[%c5, %c0_30], %42 {strides = array<i32>} : memref<8x128xf32, #tpu.memory_space<vmem>>, vector<1x128xf32>,
    %84 = vector.broadcast %77 : f32 to vector<1x128xf32>
    %c6 = arith.constant 6 : index
    %c0_31 = arith.constant 0 : index
    %85 = vector.load %arg2[%c6, %c0_31] : memref<8x128xf32, #tpu.memory_space<vmem>>, vector<1x128xf32>
    tpu.vector_store %arg2[%c6, %c0_31], %84 {strides = array<i32>} : memref<8x128xf32, #tpu.memory_space<vmem>>, vector<1x128xf32>,
    return
  }
}

</mosaic_0001>

<bundles_post_ra>
// kernel: step.1
= control target key start
LH: loop header
LB: loop body
LE: loop exit
PB: predicated region body
PF: predicated region fallthrough
CT: control target
= control target key end

     0   :  { %v14_v3 = vlaneseq  ;;  %vm60_vm2 = vcmask 1040384   ;;  %v186_v12 = vmov 1966171168   ;;  %s268_s1 = inlined_call_operand.vmem [shape: f32[8,128], index: 1, kind: input, shape index: {}, may-alias: {1,2}]   ;;  %s269_s2 = inlined_call_operand.vmem [shape: f32[8,128], index: 2, kind: output, shape index: {}, may-alias: {1,2}]   ;;  %s270_s0 = inlined_call_operand.vmem [shape: f32[1,128], index: 0, kind: input, shape index: {}]  }
   0x1   :  { %v206_v0 = vld [vmem:[%s268_s1] sm:$0xff]  ;;  %v33_v13 = vunpack.c.l.s4 %v186_v12 }
   0x2   :  { %vm49_vm0 = vcmp.eq.f32.partialorder %v206_v0, 0.0  ;;  %v210_v4 = vand.u32 127, %v14_v3  ;;  %v221_v10 = vadd.f32 1.0, %v206_v0  ;;  %v21_v11 = vshrl.u32 %v14_v3, 7  ;;  %v12_v16 = vld [vmem:[%s270_s0] sm:$0x1] }
   0x3   :  { %v50_v1 = vsel %vm49_vm0, 1.0, %v206_v0  ;;  %v34_v17 = vunpack.c.0.s8 %v33_v13  ;;  %v26_v18 = vrot.slane %v206_v0, 4  ;;  %v86_v33 = vrot.slane %v206_v0, 5 }
   0x4   :  { %v52_v2 = vrot.slane %v50_v1, 6  ;;  %vm16_vm1 = vcmp.lt.s32.totalorder %v210_v4, 2  ;;  %160 = vst [vmem:[%s269_s2] sm:$0x10] %v221_v10  ;;  %v81_v14 = vadd.f32 1.0, %v221_v10  ;;  %v22_v15 = vsub.s32 0, %v21_v11 }
   0x5   :  { %vm17_vm3 = vcmp.eq.f32.partialorder %v221_v10, 0.0  ;;  %v37_v20 = vsub.s32 %v34_v17, %v21_v11  ;;  %vm18_vm7 = vcmp.le.f32.partialorder %v221_v10, 1.0 }
   0x6   :  { %174 = vrcp.f32 %v52_v2  ;;  %v233_v19 = vrot.slane %v12_v16, %v22_v15  ;;  %v126_v37 = vrot.slane %v81_v14, 2 }
   0x7   :  { %176 = vrcp.f32 %v81_v14 }
   0x8   :  { %v28_v21 = vsel %vm17_vm3, %v233_v19, %v26_v18 }
   0x9   :  { %v29_v22 = vsel %vm16_vm1, %v28_v21, 1.0 }
   0xa   :  { %v31_v23 = vcombine.high %v29_v22, %v29_v22 }
   0xc   :  { %v38_v24 = vrot.slane %v31_v23, %v37_v20 }
   0xe   :  { %v45_v25 = vrot.slane %v38_v24, %v37_v20 }
  0x10   :  { %178 = vrcp.f32 %v45_v25 }
  0x11   :  { %180 = vrcp.f32 %v126_v37 }
  0x13   :  { %v175_v5 = vpop.eup %174 }
  0x14   :  { %v55_v6 = vmul.f32 %v175_v5, %v206_v0  ;;  %v177_v26 = vpop.eup %176  ;;  %v187_v5 = vmov 0.0  }
  0x15   :  { %v84_v27 = vsub.f32 1.0, %v177_v26 }
  0x16   :  { %v216_v7 = vsel %vm16_vm1, %v55_v6, 0.0  ;;  %v76_v6 = vsel %vm16_vm1, 0.5, %v187_v5 }
  0x17   :  { %v58_v8 = vrot.slane %v216_v7, 3  ;;  %v85_v28 = vsel %vm17_vm3, 0.0, %v84_v27 }
  0x18   :  { %v89_v29 = vsub.f32 1.0, %v85_v28  ;;  %v138_v30 = vmul.f32 %v85_v28, %v26_v18  ;;  %v88_v36 = vmul.f32 %v86_v33, %v85_v28 }
  0x19   :  { %v61_v9 = vsel %vm60_vm2, %v58_v8, 0.0 }
  0x1a   :  { %62 = vadd.xlane.f32.xlu0 %v61_v9  ;;  %v139_v31 = vmul.f32 %v89_v29, %v233_v19 }
  0x1c   :  { %v140_v32 = vadd.f32 %v139_v31, %v138_v30 }
  0x1d   :  { %v179_v34 = vpop.eup %178 }
  0x1e   :  { %156 = vst [vmem:[%s269_s2 - $0x4] sm:$0x10] %v140_v32  ;;  %v48_v35 = vmul.f32 %v179_v34, %v12_v16  ;;  %v181_v51 = vpop.eup %180 }
  0x20   :  { %v94_v38 = vrot.slane %v48_v35, %v22_v15  ;;  %v98_v43 = vsub.f32 %v48_v35, %v206_v0 }
  0x22   :  { %v96_v39 = vmul.f32 %v94_v38, %v89_v29 }
  0x24   :  { %v97_v40 = vadd.f32 %v96_v39, %v88_v36 }
  0x26   :  { %v100_v41 = vcombine.high %v97_v40, %v97_v40  ;;  %157 = vst [vmem:[%s269_s2 - $0x3] sm:$0x10] %v97_v40 }
  0x28   :  { %v107_v42 = vrot.slane %v100_v41, %v37_v20 }
  0x2a   :  { %v114_v44 = vrot.slane %v107_v42, %v37_v20 }
  0x2c   :  { %v116_v45 = vsub.f32 %v48_v35, %v114_v44 }
  0x2e   :  { %v117_v48 = vmul.f32 %v116_v45, %v98_v43 }
  0x30   :  { %v122_v50 = vrot.slane %v117_v48, %v22_v15 }
  0x32   :  { %v124_v53 = vadd.f32 %v122_v50, %v206_v0 }
  0x34   :  { %v129_v55 = vmul.f32 %v181_v51, %v124_v53  ;;  %158 = vst [vmem:[%s269_s2] sm:$0x4] %v124_v53 }
  0x36   :  { %v130_v57 = vadd.f32 1e-08, %v129_v55 }
  0x38   :  { %182 = vrsqrt.f32 %v130_v57  ;;  %vm133_vm4 = vcmp.eq.f32.partialorder %v130_v57, inf  ;;  %v136_v60 = vand.u32 2147483648, %v130_v57  ;;  %vm135_vm5 = vcmp.eq.f32.partialorder %v130_v57, 0.0 }
  0x45   :  { %v183_v59 = vpop.eup %182 }
  0x46   :  { %v132_v61 = vmul.f32 %v183_v59, %v130_v57 }
  0x48   :  { %v134_v62 = vsel %vm133_vm4, %v130_v57, %v132_v61 }
  0x49   :  { %v137_v63 = vsel %vm135_vm5, %v136_v60, %v134_v62 }
  0x4a   :  { %159 = vst [vmem:[%s269_s2 + $0x1] sm:$0x4] %v137_v63 }
  0xa3   :  { %v63_v46 = vpop.xlane.xlu0 %62 }
  0xa4   :  { %v64_v47 = vrot.slane %v63_v46, 4 }
  0xa6   :  { %v65_v49 = vadd.f32 %v64_v47, %v63_v46 }
  0xa8   :  { %v66_v52 = vrot.slane %v65_v49, 2 }
  0xaa   :  { %v67_v54 = vadd.f32 %v66_v52, %v65_v49 }
  0xac   :  { %v68_v56 = vrot.slane %v67_v54, 1 }
  0xae   :  { %v69_v58 = vadd.f32 %v68_v56, %v67_v54 }
  0xb0   :  { %168 = vpush %v69_v58 }
  0xe1   :  { %s169_s21 = spop %168 }
  0xe2   :  { %v71_v0 = vstv %s169_s21 }
  0xe3   :  { %vm72_vm6 = vcmp.eq.f32.partialorder %v71_v0, 0.0 }
  0xe4   :  { %v73_v1 = vsel %vm72_vm6, 1.0, %v71_v0 }
  0xe5   :  { %184 = vrcp.f32 %v73_v1 }
  0xf2   :  { %v185_v2 = vpop.eup %184 }
  0xf3   :  { %v75_v3 = vmul.f32 %v185_v2, %v216_v7 }
  0xf5   :  { %v78_v8 = vrot.slane %v75_v3, 7 }
  0xf7   :  { %v80_v9 = vsel %vm18_vm7, %v76_v6, %v78_v8 }
  0xf8   :  { %v141_v11 = vmul.f32 %v80_v9, %v233_v19  ;;  %161 = vst [vmem:[%s269_s2 + $0x1] sm:$0x10] %v80_v9 }
  0xfa   :  { %v142_v12 = vsel %vm16_vm1, %v141_v11, 0.0 }
  0xfb   :  { %v144_v13 = vrot.slane %v142_v12, 4 }
  0xfd   :  { %v146_v7 = vsel %vm60_vm2, %v144_v13, 0.0 }
  0xfe   :  { %147 = vadd.xlane.f32.xlu0 %v146_v7 }
 0x187   :  { %v148_v10 = vpop.xlane.xlu0 %147 }
 0x188   :  { %v149_v14 = vrot.slane %v148_v10, 4 }
 0x18a   :  { %v150_v15 = vadd.f32 %v149_v14, %v148_v10 }
 0x18c   :  { %v151_v16 = vrot.slane %v150_v15, 2 }
 0x18e   :  { %v152_v17 = vadd.f32 %v151_v16, %v150_v15 }
 0x190   :  { %v153_v18 = vrot.slane %v152_v17, 1 }
 0x192   :  { %v154_v20 = vadd.f32 %v153_v18, %v152_v17 }
 0x194   :  { %170 = vpush %v154_v20 }
 0x1c5   :  { %s171_s24 = spop %170 }
 0x1c6   :  { %v162_v19 = vstv %s171_s24 }
 0x1c7   :  { %163 = vst [vmem:[%s269_s2 + $0x6] sm:$0x1] %v162_v19 }

</bundles_post_ra>
